<compile_context>
chip_gen: v6e
topology: v6e:2x2x1
jax: 0.10.0
libtpu: 0.0.40
codegen_flags: <defaults>
</compile_context>

<pallas_src>
import math

import numpy as np
import jax
import jax.numpy as jnp
from jax.experimental import pallas as pl
from jax.experimental.pallas import tpu as pltpu


def _layernorm(x, g, b, eps=1e-5):
    mu = jnp.mean(x, axis=-1, keepdims=True)
    var = jnp.mean((x - mu) ** 2, axis=-1, keepdims=True)
    return (x - mu) * jax.lax.rsqrt(var + eps) * g + b


# ----------------------- prologue: input linear + positional encoding -------------
def _prologue_kernel(x_ref, w_ref, b_ref, pe_ref, o_ref):
    xb = x_ref[...].astype(jnp.bfloat16)
    h = jnp.dot(xb, w_ref[...], preferred_element_type=jnp.float32)
    o_ref[...] = h + b_ref[...] + pe_ref[...]


# ----------------------- main layer-streamed encoder kernel -----------------------
def make_encoder_kernel(n_layers, n_heads, bt, L, D, approx_recip=True):
    dh = D // n_heads
    R = bt * L                     # rows handled per grid block
    scale = 1.0 / math.sqrt(dh)

    def kernel(h0_ref, wq_ref, wk_ref, wv_ref, wo_ref, w1_ref, w2_ref,
               sp_ref, lnf_ref, out_ref):
        l = pl.program_id(1)       # layer axis (innermost, "arbitrary")

        # Activations are carried across the layer axis in the resident output block:
        # out_spec's block index is constant in `l`, so the same VMEM block stays live
        # for all layers of a row block.  Do NOT reorder the grid axes or change the
        # out_spec index_map without revisiting this.
        @pl.when(l == 0)
        def _():
            out_ref[...] = h0_ref[...]

        h = out_ref[...]                              # (R, D) f32 residual stream
        h_bf = h.astype(jnp.bfloat16)

        sp = sp_ref[0]                                # (10, 4D) packed per-layer vectors
        bq, bk, bv, bo = sp[0:1, :D], sp[1:2, :D], sp[2:3, :D], sp[3:4, :D]
        g1, be1 = sp[4:5, :D], sp[5:6, :D]
        b1 = sp[6:7, :]                               # (1, 4D)
        b2, g2, be2 = sp[7:8, :D], sp[8:9, :D], sp[9:10, :D]

        # --- multi-head self-attention: full-width projections (MXU N = D) ---------
        q = jnp.dot(h_bf, wq_ref[0], preferred_element_type=jnp.float32) + bq
        k = jnp.dot(h_bf, wk_ref[0], preferred_element_type=jnp.float32) + bk
        v = jnp.dot(h_bf, wv_ref[0], preferred_element_type=jnp.float32) + bv
        qb = q.reshape(bt, L, D)
        kb = k.reshape(bt, L, D)
        vb = v.reshape(bt, L, D)

        o_heads = []
        for hd in range(n_heads):                     # only the tiny LxL math per head
            lo, hi = hd * dh, (hd + 1) * dh
            s = jnp.einsum("bqd,bkd->bqk", qb[..., lo:hi], kb[..., lo:hi],
                           preferred_element_type=jnp.float32) * scale
            s = s - jnp.max(s, axis=-1, keepdims=True)
            p = jnp.exp(s)
            denom = jnp.sum(p, axis=-1, keepdims=True)
            if approx_recip:
                # EUP approx reciprocal (off the VALU critical path); small relative
                # error vs exact softmax -- acceptable for inference, configurable.
                p = p * pl.reciprocal(denom, approx=True)
            else:
                p = p / denom
            o_heads.append(jnp.einsum("bqk,bkd->bqd", p, vb[..., lo:hi],
                                      preferred_element_type=jnp.float32))
        o = jnp.concatenate(o_heads, axis=-1).reshape(R, D)     # head concat -> (R, D)
        attn = jnp.dot(o.astype(jnp.bfloat16), wo_ref[0],
                       preferred_element_type=jnp.float32) + bo

        h = _layernorm(h + attn, g1, be1)

        # --- feed-forward (relu), full-width ---------------------------------------
        y = jnp.dot(h.astype(jnp.bfloat16), w1_ref[0],
                    preferred_element_type=jnp.float32) + b1
        y = jnp.maximum(y, 0.0)
        y = jnp.dot(y.astype(jnp.bfloat16), w2_ref[0],
                    preferred_element_type=jnp.float32) + b2
        h = _layernorm(h + y, g2, be2)

        # Single store per step; final encoder LayerNorm folded into last layer store.
        @pl.when(l < n_layers - 1)
        def _():
            out_ref[...] = h

        @pl.when(l == n_layers - 1)
        def _():
            out_ref[...] = _layernorm(h, lnf_ref[0:1, :], lnf_ref[1:2, :])

    return kernel


# ----------------------------- sizing helpers --------------------------------------
def _tpu_budgets():
    try:
        vmem_cap = int(pltpu.get_tpu_info().vmem_capacity_bytes)
    except Exception:
        vmem_cap = 64 * 2**20
    try:
        kind = jax.devices()[0].device_kind.lower()
    except Exception:
        kind = ""
    return vmem_cap, kind


def _per_layer_weight_bytes(D):
    FF = 4 * D
    return (4 * D * D + 2 * D * FF) * 2 + 10 * FF * 4   # bf16 matrices + f32 packed vecs


def _select_row_tile(B, L, D, vmem_budget, kind):
    """Row tile bt (whole batch elements per block), generation aware."""
    FF = 4 * D
    # Roofline: arithmetic intensity of the layer-streamed kernel ~= R FLOP/byte of
    # streamed weights.  v6e/v7x want R >~ 700; v5e balances around ~300 rows.
    rows_target = 384 if ("v5 lite" in kind or "v5e" in kind) else 768
    per_layer_w = _per_layer_weight_bytes(D)

    def fits(bt_):
        r = bt_ * L
        act = 4 * r * D * 4 + r * (3 * D + FF) * 4       # resident blocks + intermediates
        return 2 * per_layer_w + act <= vmem_budget

    bt = max(1, min(B, rows_target // max(L, 1)))
    if "v7" in kind and B >= 2:                          # keep both v7x TensorCores busy
        bt = max(1, min(bt, B // 2))
    while B % bt:
        bt -= 1
    while bt > 1 and not fits(bt):
        bt -= 1
        while B % bt:
            bt -= 1
    return bt


# ----------------------------- wrapper ----------------------------------------------
def reference_phrase_encoder(x, params, *, n_layers, n_heads, approx_softmax_recip=True):
    B, L, D = x.shape
    assert D % n_heads == 0
    N, FF = n_layers, 4 * D

    vmem_cap, kind = _tpu_budgets()
    vmem_budget = int(0.80 * vmem_cap)                   # ~102 MiB on v5e/v6e, ~51 MiB on v7x
    bt = _select_row_tile(B, L, D, vmem_budget, kind)
    R = bt * L
    n_row_blocks = B // bt

    bf16, f32 = jnp.bfloat16, jnp.float32
    wq = params["wq"].astype(bf16)
    wk = params["wk"].astype(bf16)
    wv = params["wv"].astype(bf16)
    wo = params["wo"].astype(bf16)
    w1 = params["w1"].astype(bf16)
    w2 = params["w2"].astype(bf16)
    w_in = params["w_in"].astype(bf16)

    # Pack the 10 tiny per-layer vectors into one (N, 10, FF) f32 array (one DMA stream).
    def _pad_ff(a):                                      # (N,1,D) -> (N,1,FF)
        return jnp.pad(a, ((0, 0), (0, 0), (0, FF - a.shape[-1])))
    small = jnp.concatenate([
        _pad_ff(params["bq"]), _pad_ff(params["bk"]), _pad_ff(params["bv"]),
        _pad_ff(params["bo"]), _pad_ff(params["ln1g"]), _pad_ff(params["ln1b"]),
        params["b1"], _pad_ff(params["b2"]),
        _pad_ff(params["ln2g"]), _pad_ff(params["ln2b"]),
    ], axis=1)                                           # (N, 10, FF)
    lnf = jnp.concatenate([params["lnfg"], params["lnfb"]], axis=0)   # (2, D)

    x_flat = x.reshape(B * L, D)
    pe_tiled = jnp.tile(params["pe"], (bt, 1))           # (R, D), used by the prologue only

    # ---- prologue: y0 = x @ W_in + b_in + PE (separate call so these inputs don't
    #      stay resident through the layer-streamed loop) ----------------------------
    h0 = pl.pallas_call(
        _prologue_kernel,
        out_shape=jax.ShapeDtypeStruct((B * L, D), f32),
        grid=(n_row_blocks,),
        in_specs=[pl.BlockSpec((R, D), lambda bi: (bi, 0)),
                  pl.BlockSpec((D, D), lambda bi: (0, 0)),
                  pl.BlockSpec((1, D), lambda bi: (0, 0)),
                  pl.BlockSpec((R, D), lambda bi: (0, 0))],
        out_specs=pl.BlockSpec((R, D), lambda bi: (bi, 0)),
        compiler_params=pltpu.CompilerParams(dimension_semantics=("parallel",)),
    )(x_flat, w_in, params["b_in"], pe_tiled)

    # ---- main encoder: layer axis streams weights, output block carries activations -
    per_layer_w_bytes = _per_layer_weight_bytes(D)
    # If even double-buffering the per-layer weight set threatens the VMEM budget
    # (v7x at large D), fall back to single-buffering the big FFN weight streams.
    ffn_buf = 1 if (2 * per_layer_w_bytes > (2 * vmem_budget) // 3) else None

    def per_layer(shape, buffers=None):
        ndim = len(shape)
        idx = lambda bi, l: (l,) + (0,) * (ndim - 1)
        blk = (1,) + tuple(shape[1:])
        if buffers is None:
            return pl.BlockSpec(blk, idx)
        return pl.BlockSpec(blk, idx, pipeline_mode=pl.Buffered(buffers))

    in_specs = [
        pl.BlockSpec((R, D), lambda bi, l: (bi, 0)),               # h0 (resident per row block)
        per_layer((N, D, D)), per_layer((N, D, D)),                # wq, wk
        per_layer((N, D, D)), per_layer((N, D, D)),                # wv, wo
        per_layer((N, D, FF), ffn_buf),                            # w1
        per_layer((N, FF, D), ffn_buf),                            # w2
        per_layer((N, 10, FF)),                                    # packed per-layer vectors
        pl.BlockSpec((2, D), lambda bi, l: (0, 0)),                # final LN gamma/beta
    ]

    kernel = make_encoder_kernel(N, n_heads, bt, L, D, approx_recip=approx_softmax_recip)

    # Advisory cost estimate for the surrounding XLA schedule.
    rows = B * L
    dh = D // n_heads
    flops = (2 * rows * D * D
             + N * (8 * rows * D * D + 4 * rows * D * FF + 4 * B * n_heads * L * L * dh))
    transcendentals = N * (B * n_heads * L * L + 4 * rows) + 2 * rows
    bytes_accessed = (n_row_blocks * N * per_layer_w_bytes + 2 * rows * D * 4
                      + int(w_in.size) * 2 + rows * D * 4)

    resident_bytes = 4 * R * D * 4 + R * (3 * D + FF) * 4 + 4 * D * 4
    vmem_limit = int(min(vmem_budget,
                         max(32 * 2**20, 4 * (2 * per_layer_w_bytes + resident_bytes))))

    out = pl.pallas_call(
        kernel,
        out_shape=jax.ShapeDtypeStruct((B * L, D), f32),
        grid=(n_row_blocks, N),                                    # layer axis last (carry)
        in_specs=in_specs,
        out_specs=pl.BlockSpec((R, D), lambda bi, l: (bi, 0)),
        compiler_params=pltpu.CompilerParams(
            dimension_semantics=("parallel", "arbitrary"),
            vmem_limit_bytes=vmem_limit),
        cost_estimate=pl.CostEstimate(flops=flops,
                                      transcendentals=transcendentals,
                                      bytes_accessed=bytes_accessed),
    )(h0, wq, wk, wv, wo, w1, w2, small, lnf)
    return out.reshape(B, L, D)


# ----------------------------- pure-JAX reference ----------------------------------
# Matches the kernel's precision policy (bf16 MXU operands, f32 accumulation) so the
# self-test checks kernel structure rather than dtype policy.
def ref_forward(x, p, n_layers, n_heads):
    B, L, D = x.shape
    dh = D // n_heads
    scale = 1.0 / math.sqrt(dh)
    bf16 = jnp.bfloat16

    def mm(a, w):
        return jnp.dot(a.astype(bf16), w.astype(bf16), preferred_element_type=jnp.float32)

    h = mm(x.reshape(B * L, D), p["w_in"]) + p["b_in"]
    h = h + jnp.tile(p["pe"], (B, 1))
    for l in range(n_layers):
        q = (mm(h, p["wq"][l]) + p["bq"][l]).reshape(B, L, n_heads, dh)
        k = (mm(h, p["wk"][l]) + p["bk"][l]).reshape(B, L, n_heads, dh)
        v = (mm(h, p["wv"][l]) + p["bv"][l]).reshape(B, L, n_heads, dh)
        s = jnp.einsum("blhe,bshe->bhls", q, k,
                       preferred_element_type=jnp.float32) * scale
        a = jax.nn.softmax(s, axis=-1)
        o = jnp.einsum("bhls,bshd->blhd", a, v,
                       preferred_element_type=jnp.float32).reshape(B * L, D)
        o = mm(o, p["wo"][l]) + p["bo"][l]
        h = _layernorm(h + o, p["ln1g"][l], p["ln1b"][l])
        y = jax.nn.relu(mm(h, p["w1"][l]) + p["b1"][l])
        y = mm(y, p["w2"][l]) + p["b2"][l]
        h = _layernorm(h + y, p["ln2g"][l], p["ln2b"][l])
    h = _layernorm(h, p["lnfg"], p["lnfb"])
    return h.reshape(B, L, D)


# ----------------------------- deterministic params --------------------------------
def init_params(key, n_layers, L, D):
    FF = 4 * D
    ks = jax.random.split(key, 8)
    nrm = lambda k, s: 0.02 * jax.random.normal(k, s, dtype=jnp.float32)

    # standard sinusoidal positional encoding
    pos = jnp.arange(L, dtype=jnp.float32)[:, None]
    div = jnp.exp(jnp.arange(0, D, 2, dtype=jnp.float32) * (-math.log(10000.0) / D))
    pe = jnp.zeros((L, D), jnp.float32)
    pe = pe.at[:, 0::2].set(jnp.sin(pos * div))
    pe = pe.at[:, 1::2].set(jnp.cos(pos * div))

    N = n_layers
    return {
        "pe": pe,
        "w_in": nrm(ks[0], (D, D)), "b_in": jnp.zeros((1, D), jnp.float32),
        "wq": nrm(ks[1], (N, D, D)), "bq": jnp.zeros((N, 1, D), jnp.float32),
        "wk": nrm(ks[2], (N, D, D)), "bk": jnp.zeros((N, 1, D), jnp.float32),
        "wv": nrm(ks[3], (N, D, D)), "bv": jnp.zeros((N, 1, D), jnp.float32),
        "wo": nrm(ks[4], (N, D, D)), "bo": jnp.zeros((N, 1, D), jnp.float32),
        "ln1g": jnp.ones((N, 1, D), jnp.float32), "ln1b": jnp.zeros((N, 1, D), jnp.float32),
        "w1": nrm(ks[5], (N, D, FF)), "b1": jnp.zeros((N, 1, FF), jnp.float32),
        "w2": nrm(ks[6], (N, FF, D)), "b2": jnp.zeros((N, 1, D), jnp.float32),
        "ln2g": jnp.ones((N, 1, D), jnp.float32), "ln2b": jnp.zeros((N, 1, D), jnp.float32),
        "lnfg": jnp.ones((1, D), jnp.float32), "lnfb": jnp.zeros((1, D), jnp.float32),
    }


if __name__ == "__main__":
    # Module hyper-params: N layers, H heads, width; dropout (inference -> identity),
    # activation='relu', attention_type='full'.
    N_LAYERS, N_HEADS, WIDTH = 2, 4, 32
    B, L = 2, 8

    key = jax.random.PRNGKey(0)
    kx, kp = jax.random.split(key)
    x = jax.random.normal(kx, (B, L, WIDTH), dtype=jnp.float32)
    params = init_params(kp, N_LAYERS, L, WIDTH)

    out = reference_phrase_encoder(x, params, n_layers=N_LAYERS, n_heads=N_HEADS)
    out = jax.block_until_ready(out)

    ref = jax.block_until_ready(ref_forward(x, params, N_LAYERS, N_HEADS))
    err = float(jnp.max(jnp.abs(out - ref)))
    # Tolerance covers bf16 MXU operands + approx reciprocal in softmax (both deliberate).
    if not np.allclose(np.asarray(out), np.asarray(ref), rtol=1e-2, atol=1e-2):
        raise AssertionError(
            f"Pallas kernel output does not match JAX reference (max abs err {err:.3e})")

    # TODO(synk): dropout is treated as identity (eval mode); training-mode dropout not implemented.
    print("KERNEL_OK")
</pallas_src>

<mosaic_0001>
module attributes {stable_mosaic.version = 11 : i64} {
  func.func @_prologue_kernel(%arg0: i32, %arg1: memref<16x32xf32, #tpu.memory_space<vmem>>, %arg2: memref<32x32xbf16, #tpu.memory_space<vmem>>, %arg3: memref<1x32xf32, #tpu.memory_space<vmem>>, %arg4: memref<16x32xf32, #tpu.memory_space<vmem>>, %arg5: memref<16x32xf32, #tpu.memory_space<vmem>>) attributes {dimension_semantics = [#tpu.dimension_semantics<parallel>], iteration_bounds = array<i64: 1>, scalar_prefetch = 0 : i64, scratch_operands = 0 : i64, tpu.core_type = #tpu.core_type<tc>, window_params = [{transform_indices = @transform_0, window_bounds = array<i64: 16, 32>}, {pipeline_mode = #tpu.pipeline_mode<synchronous>, transform_indices = @transform_1, window_bounds = array<i64: 32, 32>}, {pipeline_mode = #tpu.pipeline_mode<synchronous>, transform_indices = @transform_2, window_bounds = array<i64: 1, 32>}, {pipeline_mode = #tpu.pipeline_mode<synchronous>, transform_indices = @transform_3, window_bounds = array<i64: 16, 32>}, {transform_indices = @transform_4, window_bounds = array<i64: 16, 32>}]} {
    %c0 = arith.constant 0 : index
    %c0_0 = arith.constant 0 : index
    %0 = vector.load %arg1[%c0, %c0_0] : memref<16x32xf32, #tpu.memory_space<vmem>>, vector<16x32xf32>
    %1 = arith.truncf %0 : vector<16x32xf32> to vector<16x32xbf16>
    %c0_1 = arith.constant 0 : index
    %c0_2 = arith.constant 0 : index
    %2 = vector.load %arg2[%c0_1, %c0_2] : memref<32x32xbf16, #tpu.memory_space<vmem>>, vector<32x32xbf16>
    %cst = arith.constant dense<0.000000e+00> : vector<16x32xf32>
    %3 = tpu.matmul %1, %2, %cst {dimension_numbers = #tpu.dot_dimension_numbers<[1], [0], [0], [1], [0, 0, 1, 1], [], []>} : vector<16x32xbf16>, vector<32x32xbf16>, vector<16x32xf32> -> vector<16x32xf32>
    %c0_3 = arith.constant 0 : index
    %c0_4 = arith.constant 0 : index
    %4 = vector.load %arg3[%c0_3, %c0_4] : memref<1x32xf32, #tpu.memory_space<vmem>>, vector<1x32xf32>
    %5 = vector.broadcast %4 : vector<1x32xf32> to vector<16x32xf32>
    %6 = arith.addf %3, %5 : vector<16x32xf32>
    %c0_5 = arith.constant 0 : index
    %c0_6 = arith.constant 0 : index
    %7 = vector.load %arg4[%c0_5, %c0_6] : memref<16x32xf32, #tpu.memory_space<vmem>>, vector<16x32xf32>
    %8 = arith.addf %6, %7 : vector<16x32xf32>
    %c0_7 = arith.constant 0 : index
    %c0_8 = arith.constant 0 : index
    %9 = vector.load %arg5[%c0_7, %c0_8] : memref<16x32xf32, #tpu.memory_space<vmem>>, vector<16x32xf32>
    tpu.vector_store %arg5[%c0_7, %c0_8], %8 {strides = array<i32>} : memref<16x32xf32, #tpu.memory_space<vmem>>, vector<16x32xf32>,
    return
  }
  func.func @transform_0(%arg0: i32) -> (i32, i32) {
    %c0_i32 = arith.constant 0 : i32
    %c0_i32_0 = arith.constant 0 : i32
    return %arg0, %c0_i32 : i32, i32
  }
  func.func @transform_1(%arg0: i32) -> (i32, i32) {
    %c0_i32 = arith.constant 0 : i32
    %c0_i32_0 = arith.constant 0 : i32
    %c0_i32_1 = arith.constant 0 : i32
    return %c0_i32, %c0_i32_0 : i32, i32
  }
  func.func @transform_2(%arg0: i32) -> (i32, i32) {
    %c0_i32 = arith.constant 0 : i32
    %c0_i32_0 = arith.constant 0 : i32
    %c0_i32_1 = arith.constant 0 : i32
    return %c0_i32, %c0_i32_0 : i32, i32
  }
  func.func @transform_3(%arg0: i32) -> (i32, i32) {
    %c0_i32 = arith.constant 0 : i32
    %c0_i32_0 = arith.constant 0 : i32
    %c0_i32_1 = arith.constant 0 : i32
    return %c0_i32, %c0_i32_0 : i32, i32
  }
  func.func @transform_4(%arg0: i32) -> (i32, i32) {
    %c0_i32 = arith.constant 0 : i32
    %c0_i32_0 = arith.constant 0 : i32
    return %arg0, %c0_i32 : i32, i32
  }
}

</mosaic_0001>

<bundles_post_ra>
// kernel: tpu_custom_call.1
= control target key start
LH: loop header
LB: loop body
LE: loop exit
PB: predicated region body
PF: predicated region fallthrough
CT: control target
= control target key end

     0   :  { %9 = vsyncpa [#allocation3], 0  ;;  %s330_s0 = inlined_call_operand.hbm [shape: f32[16,32], index: 0, kind: input, shape index: {}]   ;;  %s331_s1 = inlined_call_operand.hbm [shape: bf16[32,32], index: 1, kind: input, shape index: {}]   ;;  %s332_s2 = inlined_call_operand.vmem [shape: f32[1,32], index: 2, kind: input, shape index: {}]   ;;  %s333_s3 = inlined_call_operand.hbm [shape: f32[16,32], index: 3, kind: input, shape index: {}]   ;;  %s334_s4 = inlined_call_operand.hbm [shape: f32[16,32], index: 4, kind: output, shape index: {}]  }
   0x1   :  { %10 = vsyncpa [#allocation6], 0 }
   0x2   :  { %11 = vsyncpa [#allocation4], 0  ;;  %s268_s15 = smov [#allocation5]  }
   0x3   :  { %s29_s16 = sshll.u32 %s268_s15, 4  ;;  %s30_s16 = int_to_ptr.vmem [resolvable:$true] %s29_s16 }
   0x4   :  { %s190_s17 = scalar_lea.vmem %s30_s16, 256  ;;  %p195_p1 = scmp.lt.s32.totalorder %s30_s16, %s30_s16 }
   0x5   :  { %p191_p0 = scmp.ne.s32.totalorder %s30_s16, %s190_s17  ;;  %p196_p2 = scmp.lt.s32.totalorder %s190_s17, %s190_s17 }
   0x7   :  { %p197_p3 = por %p196_p2, %p195_p1 }
   0x9   :  { %p198_p4 = pnand %p197_p3, %p191_p0 }
   0xb   :  { %201 = shalt.err (!%p198_p4)
}
   0xc   :  { %s269_s18 = smov 64   ;;  %s270_s19 = smov 4  }
   0xd   :  { %35 = dma.hbm_to_vmem [thread:$0]  %s331_s1, 256, %s30_s16, [#allocation6], %s269_s18, %s269_s18, %s270_s19  }
   0xe   :  { %s271_s22 = smov [#allocation2]  }
   0xf   :  { %s17_s23 = sshll.u32 %s271_s22, 4  ;;  %s18_s23 = int_to_ptr.vmem [resolvable:$true] %s17_s23 }
  0x10   :  { %s210_s24 = scalar_lea.vmem %s18_s23, 256  ;;  %p215_p6 = scmp.lt.s32.totalorder %s18_s23, %s18_s23 }
  0x11   :  { %p211_p5 = scmp.ne.s32.totalorder %s18_s23, %s210_s24  ;;  %p216_p7 = scmp.lt.s32.totalorder %s210_s24, %s210_s24 }
  0x13   :  { %p217_p8 = por %p216_p7, %p215_p6 }
  0x15   :  { %p218_p9 = pnand %p217_p8, %p211_p5 }
  0x17   :  { %221 = shalt.err (!%p218_p9)
}
  0x18   :  { %s272_s25 = smov 128   ;;  %s273_s26 = smov 8  }
  0x19   :  { %23 = dma.hbm_to_vmem [thread:$0]  %s330_s0, 256, %s18_s23, [#allocation3], %s272_s25, %s272_s25, %s273_s26  }
  0x1a   :  { %s274_s1 = smov [#allocation7]  }
  0x1b   :  { %s43_s29 = sshll.u32 %s274_s1, 4  ;;  %s44_s29 = int_to_ptr.vmem [resolvable:$true] %s43_s29 }
  0x1c   :  { %s230_s30 = scalar_lea.vmem %s44_s29, 256  ;;  %p235_p11 = scmp.lt.s32.totalorder %s44_s29, %s44_s29 }
  0x1d   :  { %p231_p10 = scmp.ne.s32.totalorder %s44_s29, %s230_s30  ;;  %p236_p12 = scmp.lt.s32.totalorder %s230_s30, %s230_s30 }
  0x1f   :  { %p237_p13 = por %p236_p12, %p235_p11 }
  0x21   :  { %p238_p0 = pnand %p237_p13, %p231_p10 }
  0x23   :  { %241 = shalt.err (!%p238_p0)
}
  0x24   :  { %49 = dma.hbm_to_vmem [thread:$0]  %s333_s3, 256, %s44_s29, [#allocation6], %s272_s25, %s272_s25, %s273_s26  }
  0x25   :  { %262 = dma.done.wait [#allocation3], 256  }
  0x26   :  { %263 = vsyncadd [#allocation3], 4294967040 }
  0x27   :  { %264 = dma.done.wait [#allocation6], 512  }
  0x28   :  { %265 = vsyncadd [#allocation6], 4294966784  ;;  %v275_v0 = vmov 0.0   ;;  %vm276_vm0 = vmmov 0   ;;  %v180_v1 = vld [vmem:[#allocation5 + $0x8] sm:$0xff]   ;;  %v181_v2 = vld [vmem:[#allocation5] sm:$0xff]  }
  0x29   :  { %162 = vmatprep.subr.bf16.mxu0 %v275_v0  ;;  %166 = vmatprep.mubr.msk.bf16.mxu0 %vm276_vm0, %v275_v0  ;;  %v60_v3 = vld [vmem:[#allocation2] sm:$0xff]  ;;  %v61_v4 = vld [vmem:[#allocation2 + $0x8] sm:$0xff]  ;;  %vm86_vm1 = vcmask 261120   ;;  %s277_s7 = smov [#allocation8]  }
  0x2a   :  { %163 = vmatpush3.bf16.msra.mxu0 %v180_v1  ;;  %v62_v5 = vpack.c.bf16 %v61_v4, %v60_v3  ;;  %v155_v6 = vld [vmem:[%s332_s2] ss:$0 sm:$0xff]  ;;  %v132_v13 = vld [vmem:[#allocation7 + $0x8] sm:$0xff]  ;;  %s142_s8 = sshll.u32 %s277_s7, 4  ;;  %s143_s8 = int_to_ptr.vmem [resolvable:$true] %s142_s8 }
  0x2b   :  { %164 = vmatprep.subr.bf16.mxu0 %v275_v0  ;;  %v131_v8 = vld [vmem:[#allocation7] sm:$0xff]  ;;  %s242_s9 = scalar_lea.vmem %s143_s8, 256  ;;  %p247_p2 = scmp.lt.s32.totalorder %s143_s8, %s143_s8 }
  0x2c   :  { %p243_p1 = scmp.ne.s32.totalorder %s143_s8, %s242_s9  ;;  %p248_p3 = scmp.lt.s32.totalorder %s242_s9, %s242_s9 }
  0x2e   :  { %165 = vmatpush3.bf16.msra.mxu0 %v181_v2  ;;  %p249_p4 = por %p248_p3, %p247_p2 }
  0x30   :  { %p250_p5 = pnand %p249_p4, %p243_p1 }
  0x31   :  { %167 = vmatmul.mubr.msk.bf16.vlgmr.msra.gmra.mxu0 %vm86_vm1, %v62_v5 }
  0xf1   :  { %v124_v7 = vpop.f32.mrf.mxu0 }
  0xf2   :  { %v125_v9 = vadd.f32 %v155_v6, %v124_v7 }
  0xf3   :  { %v168_v10 = vpop.f32.mrf.mxu0 }
  0xf4   :  { %v133_v11 = vadd.f32 %v131_v8, %v125_v9 }
  0xf5   :  { %v127_v12 = vpop.f32.mrf.mxu0 }
  0xf6   :  { %135 = vst.msk [vmem:[#allocation8] sm:$0xff] %vm86_vm1, %v133_v11  ;;  %v128_v14 = vadd.f32 %v155_v6, %v127_v12 }
  0xf7   :  { %v169_v15 = vpop.f32.mrf.mxu0 }
  0xf8   :  { %v134_v16 = vadd.f32 %v132_v13, %v128_v14 }
  0xfa   :  { %136 = vst.msk [vmem:[#allocation8 + $0x8] sm:$0xff] %vm86_vm1, %v134_v16 }
  0xfb   :  { %253 = shalt.err (!%p250_p5)
}
  0xfc   :  { %148 = dma.vmem_to_hbm [thread:$0]  %s143_s8, 256, %s334_s4, [#allocation4], %s272_s25, %s272_s25, %s273_s26  }
  0xfd   :  { %266 = dma.done.wait [#allocation4], 256  }
  0xfe   :  { %267 = vsyncadd [#allocation4], 4294967040 }
  0xff   :  { %152 = vsyncpa [#allocation3], 1 }
 0x100   :  { %153 = vsyncpa [#allocation6], 1 }
 0x101   :  { %154 = vsyncpa [#allocation4], 1 }

</bundles_post_ra>
